<compile_context>
chip_gen: v6e
topology: v6e:2x2x1
jax: 0.10.0
libtpu: 0.0.40
codegen_flags: <defaults>
</compile_context>

<pallas_src>
import functools

import jax
import jax.numpy as jnp
from jax.experimental import pallas as pl
from jax.experimental.pallas import tpu as pltpu


def _cnn_kernel(x_ref, w_ref, b_ref, mask_ref, lw_ref, lb_ref, o_ref, *,
                T_pad, K_max, D):
    """Tap-accumulated conv + bias + ReLU + masked max-pool + f32 classifier.

    x_ref:    [TB, S_pad, D]   bf16  (zero-padded along S so K_max taps fit)
    w_ref:    [K_max*D, NB]    bf16  (all conv branches packed along columns,
                                      shorter kernels zero-padded in taps)
    b_ref:    [1, NB]          f32
    mask_ref: [T_pad, NB]      f32   (1.0 = valid window position, 0.0 = pad)
    lw_ref:   [NB, C_pad]      f32   (classifier weight, zero-padded to 128)
    lb_ref:   [1, C_pad]       f32
    o_ref:    [TB, C_pad]      f32
    """
    TB = x_ref.shape[0]
    NB = w_ref.shape[1]
    M = TB * T_pad

    # --- conv for every branch at once: K_max accumulated 2-D matmuls ------
    # (no im2col slab / lane concatenation; T_pad is sublane-tile aligned so
    #  the reshape is a pure relabel of the (sublane, lane) tiling)
    acc = jnp.zeros((M, NB), jnp.float32)
    for j in range(K_max):
        xj = x_ref[:, j:j + T_pad, :].reshape(M, D)           # [M, D] bf16
        acc = acc + jnp.dot(xj, w_ref[j * D:(j + 1) * D, :],
                            preferred_element_type=jnp.float32)

    # --- bias + ReLU (f32 VPU math) -----------------------------------------
    h = jnp.maximum(acc + b_ref[...], 0.0)                     # [M, NB]

    # --- masked max-pool over time ------------------------------------------
    # Window positions invalid for the shorter branches (and T padding) are
    # zeroed; safe because ReLU output >= 0, so zeros never win the max.
    h = h.reshape(TB, T_pad, NB) * mask_ref[...]               # [TB, T_pad, NB]
    feat = jnp.max(h, axis=1)                                  # [TB, NB] f32

    # --- classifier: f32 matmul into a lane-dense (128-col) output ----------
    o_ref[...] = (jnp.dot(feat, lw_ref[...],
                          preferred_element_type=jnp.float32) + lb_ref[...])


def cnn_forward(word, sentence_length, params, *, kernel_sizes, kernel_num,
                num_labels):
    """word: [B, S] int32 ids. sentence_length unused (as in the torch forward)."""
    del sentence_length
    kernel_sizes = tuple(kernel_sizes)
    K_min, K_max = min(kernel_sizes), max(kernel_sizes)
    N = kernel_num
    NB = len(kernel_sizes) * N                       # total conv channels
    C = num_labels
    C_pad = 128                                      # lane-dense output columns

    embed = params["embed"]
    B, S = word.shape
    D = embed.shape[1]

    T = S - K_min + 1                                # fused window count
    T_pad = int(pl.cdiv(T, 16)) * 16                 # bf16 sublane-tile aligned
    S_pad = T_pad + K_max - 1                        # so all K_max taps fit

    # Embedding lookup (glue). Gather first, then cast only B*S*D values.
    x = embed[word].astype(jnp.bfloat16)             # [B, S, D]
    x = jnp.pad(x, ((0, 0), (0, S_pad - S), (0, 0))) # [B, S_pad, D]

    # Pack all conv branches into one [K_max*D, NB] weight (zero-padded taps),
    # one bias row, and one static 0/1 pooling mask for the padded positions.
    w_fused = jnp.zeros((K_max, D, NB), jnp.float32)
    biases, mask_cols = [], []
    for ci, K in enumerate(kernel_sizes):
        w_fused = w_fused.at[:K, :, ci * N:(ci + 1) * N].set(params[f"conv{K}_w"])
        biases.append(params[f"conv{K}_b"])          # [1, N] f32
        col = (jnp.arange(T_pad) < (S - K + 1)).astype(jnp.float32)
        mask_cols.append(jnp.tile(col[:, None], (1, N)))
    w_fused = w_fused.reshape(K_max * D, NB).astype(jnp.bfloat16)
    b_fused = jnp.concatenate(biases, axis=1)        # [1, NB]  f32
    mask = jnp.concatenate(mask_cols, axis=1)        # [T_pad, NB] f32

    # Classifier, zero-padded to 128 columns so the output store is lane-dense.
    lin_w = jnp.zeros((NB, C_pad), jnp.float32).at[:, :C].set(params["lin_w"])
    lin_b = jnp.zeros((1, C_pad), jnp.float32).at[:, :C].set(params["lin_b"])

    # Batch tile: target TB*T_pad >= ~256 MXU rows, capped by a conservative
    # ~8 MiB VMEM budget for the double-buffered x block (safe even on v7x's
    # 32 MiB scoped default). For large B the grid has many "parallel" steps,
    # which also feeds both v7x TensorCores; at tiny B it collapses to 1 step.
    x_row_bytes = S_pad * D * 2                      # bf16 bytes per batch row
    tb_vmem_cap = max(1, (8 << 20) // (2 * x_row_bytes))
    TB = int(min(B, max(1, pl.cdiv(256, T_pad)), tb_vmem_cap))
    if TB < B:
        TB = max(8, (TB // 8) * 8)                   # 8-aligned output sublanes
    B_pad = int(pl.cdiv(B, TB)) * TB
    if B_pad != B:
        x = jnp.pad(x, ((0, B_pad - B), (0, 0), (0, 0)))
    grid = (B_pad // TB,)

    kernel = functools.partial(_cnn_kernel, T_pad=T_pad, K_max=K_max, D=D)

    logits_pad = pl.pallas_call(
        kernel,
        out_shape=jax.ShapeDtypeStruct((B_pad, C_pad), jnp.float32),
        grid_spec=pltpu.PrefetchScalarGridSpec(
            num_scalar_prefetch=0,
            grid=grid,
            in_specs=[
                pl.BlockSpec((TB, S_pad, D), lambda i: (i, 0, 0)),   # x
                pl.BlockSpec((K_max * D, NB), lambda i: (0, 0)),     # fused conv W
                pl.BlockSpec((1, NB), lambda i: (0, 0)),             # fused conv b
                pl.BlockSpec((T_pad, NB), lambda i: (0, 0)),         # pooling mask
                pl.BlockSpec((NB, C_pad), lambda i: (0, 0)),         # linear W
                pl.BlockSpec((1, C_pad), lambda i: (0, 0)),          # linear b
            ],
            out_specs=pl.BlockSpec((TB, C_pad), lambda i: (i, 0)),
        ),
        compiler_params=pltpu.CompilerParams(
            dimension_semantics=("parallel",)),
    )(x, w_fused, b_fused, mask, lin_w, lin_b)
    return logits_pad[:B, :C]


def init_params(key, V, D, N, kernel_sizes, C, padding_id):
    """Deterministic synthetic parameters matching the PyTorch module shapes."""
    keys = jax.random.split(key, 2 * len(kernel_sizes) + 3)
    params = {}
    embed = 0.1 * jax.random.normal(keys[0], (V, D), jnp.float32)
    embed = embed.at[padding_id].set(0.0)             # padding_idx row = 0
    params["embed"] = embed
    for i, K in enumerate(kernel_sizes):
        # PyTorch Conv2d weight layout: [N, Ci=1, K, D] -> kernel layout [K, D, N]
        w_pt = 0.1 * jax.random.normal(keys[1 + 2 * i], (N, 1, K, D), jnp.float32)
        params[f"conv{K}_w"] = jnp.transpose(w_pt[:, 0], (1, 2, 0))
        params[f"conv{K}_b"] = 0.01 * jax.random.normal(
            keys[2 + 2 * i], (1, N), jnp.float32)
    F_total = len(kernel_sizes) * N
    # PyTorch Linear weight layout: [C, F] -> kernel layout [F, C]
    lin_w_pt = 0.1 * jax.random.normal(keys[-2], (C, F_total), jnp.float32)
    params["lin_w"] = lin_w_pt.T
    params["lin_b"] = 0.01 * jax.random.normal(keys[-1], (1, C), jnp.float32)
    return params


def reference_forward(word, params, kernel_sizes, N, C):
    """Pure-JAX reference mirroring the PyTorch forward (eval mode)."""
    x = params["embed"][word]                         # [B, S, D]
    feats = []
    for K in kernel_sizes:
        w = params[f"conv{K}_w"]                      # [K, D, N]
        b = params[f"conv{K}_b"]                      # [1, N]
        T = x.shape[1] - K + 1
        outs = []
        for t in range(T):
            window = x[:, t:t + K, :]                 # [B, K, D]
            outs.append(
                jnp.einsum("bkd,kdn->bn", window, w,
                           precision=jax.lax.Precision.HIGHEST) + b)
        conv = jnp.maximum(jnp.stack(outs, axis=1), 0.0)     # relu(conv).squeeze(3)
        feats.append(conv.max(axis=1))                       # max_pool1d over time
    feat = jnp.concatenate(feats, axis=1)
    return jnp.dot(feat, params["lin_w"],
                   precision=jax.lax.Precision.HIGHEST) + params["lin_b"]


if __name__ == "__main__":
    # Small, module-consistent shapes.
    V, D, N, C = 50, 32, 8, 5          # embed_num, embed_dim, conv_filter_nums, label_num
    kernel_sizes = (3, 4, 5)           # conv_filter_sizes
    padding_id = 0                     # paddingId
    B, S = 2, 12                       # batch, seq_len

    key = jax.random.PRNGKey(0)
    k_param, k_word = jax.random.split(key)
    params = init_params(k_param, V, D, N, kernel_sizes, C, padding_id)
    word = jax.random.randint(k_word, (B, S), 1, V, dtype=jnp.int32)
    sentence_length = jnp.full((B,), S, dtype=jnp.int32)

    logits = cnn_forward(word, sentence_length, params,
                         kernel_sizes=kernel_sizes, kernel_num=N, num_labels=C)
    jax.block_until_ready(logits)

    ref = reference_forward(word, params, kernel_sizes, N, C)
    assert logits.shape == (B, C)
    # Tolerance covers bf16 conv inputs vs the f32 HIGHEST-precision reference.
    if not jnp.allclose(logits, ref, atol=2e-2, rtol=2e-2):
        raise AssertionError("Pallas kernel output does not match reference")
    print("KERNEL_OK")
</pallas_src>

<mosaic_0001>
module attributes {stable_mosaic.version = 11 : i64} {
  func.func @_cnn_kernel(%arg0: i32, %arg1: memref<2x20x32xbf16, #tpu.memory_space<vmem>>, %arg2: memref<160x24xbf16, #tpu.memory_space<vmem>>, %arg3: memref<1x24xf32, #tpu.memory_space<vmem>>, %arg4: memref<16x24xf32, #tpu.memory_space<vmem>>, %arg5: memref<24x128xf32, #tpu.memory_space<vmem>>, %arg6: memref<1x128xf32, #tpu.memory_space<vmem>>, %arg7: memref<2x128xf32, #tpu.memory_space<vmem>>) attributes {dimension_semantics = [#tpu.dimension_semantics<parallel>], iteration_bounds = array<i64: 1>, scalar_prefetch = 0 : i64, scratch_operands = 0 : i64, tpu.core_type = #tpu.core_type<tc>, window_params = [{transform_indices = @transform_0, window_bounds = array<i64: 2, 20, 32>}, {pipeline_mode = #tpu.pipeline_mode<synchronous>, transform_indices = @transform_1, window_bounds = array<i64: 160, 24>}, {pipeline_mode = #tpu.pipeline_mode<synchronous>, transform_indices = @transform_2, window_bounds = array<i64: 1, 24>}, {pipeline_mode = #tpu.pipeline_mode<synchronous>, transform_indices = @transform_3, window_bounds = array<i64: 16, 24>}, {pipeline_mode = #tpu.pipeline_mode<synchronous>, transform_indices = @transform_4, window_bounds = array<i64: 24, 128>}, {pipeline_mode = #tpu.pipeline_mode<synchronous>, transform_indices = @transform_5, window_bounds = array<i64: 1, 128>}, {transform_indices = @transform_6, window_bounds = array<i64: 2, 128>}]} {
    %cst = arith.constant 0.000000e+00 : f32
    %0 = vector.broadcast %cst : f32 to vector<32x24xf32>
    %c0 = arith.constant 0 : index
    %c0_0 = arith.constant 0 : index
    %c0_1 = arith.constant 0 : index
    %1 = vector.load %arg1[%c0, %c0_0, %c0_1] : memref<2x20x32xbf16, #tpu.memory_space<vmem>>, vector<2x16x32xbf16>
    %2 = vector.shape_cast %1 : vector<2x16x32xbf16> to vector<32x32xbf16>
    %c0_2 = arith.constant 0 : index
    %c0_3 = arith.constant 0 : index
    %3 = vector.load %arg2[%c0_2, %c0_3] : memref<160x24xbf16, #tpu.memory_space<vmem>>, vector<32x24xbf16>
    %cst_4 = arith.constant dense<0.000000e+00> : vector<32x24xf32>
    %4 = tpu.matmul %2, %3, %cst_4 {dimension_numbers = #tpu.dot_dimension_numbers<[1], [0], [0], [1], [0, 0, 1, 1], [], []>} : vector<32x32xbf16>, vector<32x24xbf16>, vector<32x24xf32> -> vector<32x24xf32>
    %5 = arith.addf %0, %4 : vector<32x24xf32>
    %c0_5 = arith.constant 0 : index
    %c1 = arith.constant 1 : index
    %c0_6 = arith.constant 0 : index
    %6 = vector.load %arg1[%c0_5, %c1, %c0_6] : memref<2x20x32xbf16, #tpu.memory_space<vmem>>, vector<2x16x32xbf16>
    %7 = vector.shape_cast %6 : vector<2x16x32xbf16> to vector<32x32xbf16>
    %c32 = arith.constant 32 : index
    %c0_7 = arith.constant 0 : index
    %8 = vector.load %arg2[%c32, %c0_7] : memref<160x24xbf16, #tpu.memory_space<vmem>>, vector<32x24xbf16>
    %cst_8 = arith.constant dense<0.000000e+00> : vector<32x24xf32>
    %9 = tpu.matmul %7, %8, %cst_8 {dimension_numbers = #tpu.dot_dimension_numbers<[1], [0], [0], [1], [0, 0, 1, 1], [], []>} : vector<32x32xbf16>, vector<32x24xbf16>, vector<32x24xf32> -> vector<32x24xf32>
    %10 = arith.addf %5, %9 : vector<32x24xf32>
    %c0_9 = arith.constant 0 : index
    %c2 = arith.constant 2 : index
    %c0_10 = arith.constant 0 : index
    %11 = vector.load %arg1[%c0_9, %c2, %c0_10] : memref<2x20x32xbf16, #tpu.memory_space<vmem>>, vector<2x16x32xbf16>
    %12 = vector.shape_cast %11 : vector<2x16x32xbf16> to vector<32x32xbf16>
    %c64 = arith.constant 64 : index
    %c0_11 = arith.constant 0 : index
    %13 = vector.load %arg2[%c64, %c0_11] : memref<160x24xbf16, #tpu.memory_space<vmem>>, vector<32x24xbf16>
    %cst_12 = arith.constant dense<0.000000e+00> : vector<32x24xf32>
    %14 = tpu.matmul %12, %13, %cst_12 {dimension_numbers = #tpu.dot_dimension_numbers<[1], [0], [0], [1], [0, 0, 1, 1], [], []>} : vector<32x32xbf16>, vector<32x24xbf16>, vector<32x24xf32> -> vector<32x24xf32>
    %15 = arith.addf %10, %14 : vector<32x24xf32>
    %c0_13 = arith.constant 0 : index
    %c3 = arith.constant 3 : index
    %c0_14 = arith.constant 0 : index
    %16 = vector.load %arg1[%c0_13, %c3, %c0_14] : memref<2x20x32xbf16, #tpu.memory_space<vmem>>, vector<2x16x32xbf16>
    %17 = vector.shape_cast %16 : vector<2x16x32xbf16> to vector<32x32xbf16>
    %c96 = arith.constant 96 : index
    %c0_15 = arith.constant 0 : index
    %18 = vector.load %arg2[%c96, %c0_15] : memref<160x24xbf16, #tpu.memory_space<vmem>>, vector<32x24xbf16>
    %cst_16 = arith.constant dense<0.000000e+00> : vector<32x24xf32>
    %19 = tpu.matmul %17, %18, %cst_16 {dimension_numbers = #tpu.dot_dimension_numbers<[1], [0], [0], [1], [0, 0, 1, 1], [], []>} : vector<32x32xbf16>, vector<32x24xbf16>, vector<32x24xf32> -> vector<32x24xf32>
    %20 = arith.addf %15, %19 : vector<32x24xf32>
    %c0_17 = arith.constant 0 : index
    %c4 = arith.constant 4 : index
    %c0_18 = arith.constant 0 : index
    %21 = vector.load %arg1[%c0_17, %c4, %c0_18] : memref<2x20x32xbf16, #tpu.memory_space<vmem>>, vector<2x16x32xbf16>
    %22 = vector.shape_cast %21 : vector<2x16x32xbf16> to vector<32x32xbf16>
    %c128 = arith.constant 128 : index
    %c0_19 = arith.constant 0 : index
    %23 = vector.load %arg2[%c128, %c0_19] : memref<160x24xbf16, #tpu.memory_space<vmem>>, vector<32x24xbf16>
    %cst_20 = arith.constant dense<0.000000e+00> : vector<32x24xf32>
    %24 = tpu.matmul %22, %23, %cst_20 {dimension_numbers = #tpu.dot_dimension_numbers<[1], [0], [0], [1], [0, 0, 1, 1], [], []>} : vector<32x32xbf16>, vector<32x24xbf16>, vector<32x24xf32> -> vector<32x24xf32>
    %25 = arith.addf %20, %24 : vector<32x24xf32>
    %c0_21 = arith.constant 0 : index
    %c0_22 = arith.constant 0 : index
    %26 = vector.load %arg3[%c0_21, %c0_22] : memref<1x24xf32, #tpu.memory_space<vmem>>, vector<1x24xf32>
    %27 = vector.broadcast %26 : vector<1x24xf32> to vector<32x24xf32>
    %28 = arith.addf %25, %27 : vector<32x24xf32>
    %cst_23 = arith.constant 0.000000e+00 : f32
    %29 = vector.broadcast %cst_23 : f32 to vector<32x24xf32>
    %30 = arith.maximumf %28, %29 : vector<32x24xf32>
    %31 = vector.shape_cast %30 : vector<32x24xf32> to vector<2x16x24xf32>
    %c0_24 = arith.constant 0 : index
    %c0_25 = arith.constant 0 : index
    %32 = vector.load %arg4[%c0_24, %c0_25] : memref<16x24xf32, #tpu.memory_space<vmem>>, vector<16x24xf32>
    %33 = vector.shape_cast %32 : vector<16x24xf32> to vector<1x16x24xf32>
    %34 = vector.broadcast %33 : vector<1x16x24xf32> to vector<2x16x24xf32>
    %35 = arith.mulf %31, %34 : vector<2x16x24xf32>
    %cst_26 = arith.constant dense<0xFF800000> : vector<2x24xf32>
    %36 = vector.multi_reduction <maximumf>, %35, %cst_26 [1] : vector<2x16x24xf32> to vector<2x24xf32>
    %c0_27 = arith.constant 0 : index
    %c0_28 = arith.constant 0 : index
    %37 = vector.load %arg5[%c0_27, %c0_28] : memref<24x128xf32, #tpu.memory_space<vmem>>, vector<24x128xf32>
    %cst_29 = arith.constant dense<0.000000e+00> : vector<2x128xf32>
    %38 = tpu.matmul %36, %37, %cst_29 {dimension_numbers = #tpu.dot_dimension_numbers<[1], [0], [0], [1], [0, 0, 1, 1], [], []>} : vector<2x24xf32>, vector<24x128xf32>, vector<2x128xf32> -> vector<2x128xf32>
    %c0_30 = arith.constant 0 : index
    %c0_31 = arith.constant 0 : index
    %39 = vector.load %arg6[%c0_30, %c0_31] : memref<1x128xf32, #tpu.memory_space<vmem>>, vector<1x128xf32>
    %40 = vector.broadcast %39 : vector<1x128xf32> to vector<2x128xf32>
    %41 = arith.addf %38, %40 : vector<2x128xf32>
    %c0_32 = arith.constant 0 : index
    %c0_33 = arith.constant 0 : index
    %42 = vector.load %arg7[%c0_32, %c0_33] : memref<2x128xf32, #tpu.memory_space<vmem>>, vector<2x128xf32>
    tpu.vector_store %arg7[%c0_32, %c0_33], %41 {strides = array<i32>} : memref<2x128xf32, #tpu.memory_space<vmem>>, vector<2x128xf32>,
    return
  }
  func.func @transform_0(%arg0: i32) -> (i32, i32, i32) {
    %c0_i32 = arith.constant 0 : i32
    %c0_i32_0 = arith.constant 0 : i32
    %c0_i32_1 = arith.constant 0 : i32
    return %arg0, %c0_i32, %c0_i32_0 : i32, i32, i32
  }
  func.func @transform_1(%arg0: i32) -> (i32, i32) {
    %c0_i32 = arith.constant 0 : i32
    %c0_i32_0 = arith.constant 0 : i32
    %c0_i32_1 = arith.constant 0 : i32
    return %c0_i32, %c0_i32_0 : i32, i32
  }
  func.func @transform_2(%arg0: i32) -> (i32, i32) {
    %c0_i32 = arith.constant 0 : i32
    %c0_i32_0 = arith.constant 0 : i32
    %c0_i32_1 = arith.constant 0 : i32
    return %c0_i32, %c0_i32_0 : i32, i32
  }
  func.func @transform_3(%arg0: i32) -> (i32, i32) {
    %c0_i32 = arith.constant 0 : i32
    %c0_i32_0 = arith.constant 0 : i32
    %c0_i32_1 = arith.constant 0 : i32
    return %c0_i32, %c0_i32_0 : i32, i32
  }
  func.func @transform_4(%arg0: i32) -> (i32, i32) {
    %c0_i32 = arith.constant 0 : i32
    %c0_i32_0 = arith.constant 0 : i32
    %c0_i32_1 = arith.constant 0 : i32
    return %c0_i32, %c0_i32_0 : i32, i32
  }
  func.func @transform_5(%arg0: i32) -> (i32, i32) {
    %c0_i32 = arith.constant 0 : i32
    %c0_i32_0 = arith.constant 0 : i32
    %c0_i32_1 = arith.constant 0 : i32
    return %c0_i32, %c0_i32_0 : i32, i32
  }
  func.func @transform_6(%arg0: i32) -> (i32, i32) {
    %c0_i32 = arith.constant 0 : i32
    %c0_i32_0 = arith.constant 0 : i32
    return %arg0, %c0_i32 : i32, i32
  }
}

</mosaic_0001>

<bundles_post_ra>
// kernel: tpu_custom_call.1
= control target key start
LH: loop header
LB: loop body
LE: loop exit
PB: predicated region body
PF: predicated region fallthrough
CT: control target
= control target key end

     0   :  { %vm108_vm0 = vcmask 261120   ;;  %vm247_vm1 = vcmask 1042432   ;;  %vm248_vm2 = vcmask 1046532   ;;  %vm35_vm3 = vsmask.f32 3328  ;;  %s1107_s0 = inlined_call_operand.vmem [shape: bf16[2,20,32], index: 0, kind: input, shape index: {}]   ;;  %s1108_s1 = inlined_call_operand.vmem [shape: bf16[160,24], index: 1, kind: input, shape index: {}]   ;;  %s1109_s2 = inlined_call_operand.vmem [shape: f32[1,24], index: 2, kind: input, shape index: {}]   ;;  %s1110_s3 = inlined_call_operand.vmem [shape: f32[16,24], index: 3, kind: input, shape index: {}]   ;;  %s1111_s4 = inlined_call_operand.vmem [shape: f32[24,128], index: 4, kind: input, shape index: {}]   ;;  %s1112_s5 = inlined_call_operand.vmem [shape: f32[1,128], index: 5, kind: input, shape index: {}]   ;;  %s1113_s6 = inlined_call_operand.hbm [shape: f32[2,128], index: 6, kind: output, shape index: {}]  }
   0x1   :  { %v835_v0 = vld [vmem:[%s1108_s1 + $0x18] sm:$0xff]   ;;  %v836_v1 = vld [vmem:[%s1108_s1 + $0x8] sm:$0xff]   ;;  %v837_v2 = vld [vmem:[%s1108_s1 + $0x10] sm:$0xff]   ;;  %vm36_vm4 = vsmask.f32 7440  ;;  %vm483_vm9 = vcmask 1041408  }
   0x2   :  { %783 = vmatprep.subr.bf16.mxu0 %v835_v0  ;;  %791 = vmatprep.subr.bf16.mxu1 %v836_v1  ;;  %v838_v3 = vld [vmem:[%s1108_s1] sm:$0xff]   ;;  %v930_v6 = vld [vmem:[%s1107_s0 + $0x8] sm:$0x1]  ;;  %v842_v17 = vld [vmem:[%s1108_s1 + $0x38] sm:$0xff]   ;;  %vm347_vm7 = vsmask.f32 2304 }
   0x3   :  { %784 = vmatpush3.bf16.msra.mxu0 %v835_v0  ;;  %792 = vmatpush3.bf16.msra.mxu1 %v836_v1  ;;  %v25_v4 = vld [vmem:[%s1107_s0] sm:$0xf]  ;;  %v925_v5 = vld [vmem:[%s1107_s0 + $0x4] sm:$0xf]  ;;  %v58_v11 = vshll.u32 %v930_v6, 16  ;;  %v255_v12 = vrot.slane %v930_v6, 5  ;;  %vm962_vm5 = vmor %vm35_vm3, %vm36_vm4 }
   0x4   :  { %785 = vmatprep.subr.bf16.mxu0 %v837_v2  ;;  %793 = vmatprep.subr.bf16.mxu1 %v838_v3  ;;  %v39_v7 = vshrl.u32 %v25_v4, 16  ;;  %v42_v8 = vshll.u32 %v25_v4, 16  ;;  %v48_v9 = vshll.u32 %v925_v5, 16  ;;  %v52_v10 = vshrl.u32 %v925_v5, 16  ;;  %v940_v16 = vld [vmem:[%s1108_s1 + $0x28] sm:$0xff]   ;;  %vm975_vm6 = vmor %vm247_vm1, %vm248_vm2  ;;  %v844_v49 = vld [vmem:[%s1108_s1 + $0x30] sm:$0xff]  }
   0x5   :  { %v728_v15 = vcombine.low %v25_v4, %v925_v5  ;;  %v60_v20 = vrot.slane %v58_v11, 5  ;;  %v27_v22 = vld [vmem:[%s1107_s0 + $0xc] sm:$0xf]  ;;  %v953_v25 = vld [vmem:[%s1107_s0 + $0x10] sm:$0xf]  ;;  %v252_v51 = vrot.slane %v925_v5, 5 }
   0x6   :  { %v41_v13 = vrot.slane %v39_v7, 4  ;;  %v44_v14 = vrot.slane %v42_v8, 5  ;;  %v50_v18 = vrot.slane %v48_v9, 5  ;;  %v54_v19 = vrot.slane %v52_v10, 4  ;;  %v958_v26 = vld [vmem:[%s1107_s0 + $0x14] sm:$0x1] }
   0x7   :  { %786 = vmatpush3.bf16.msra.mxu0 %v837_v2  ;;  %794 = vmatpush3.bf16.msra.mxu1 %v838_v3  ;;  %v359_v21 = vrot.slane %v52_v10, 5  ;;  %v360_v24 = vrot.slane %v48_v9, 6  ;;  %v63_v27 = vshrl.u32 %v27_v22, 16  ;;  %v66_v30 = vshll.u32 %v27_v22, 16  ;;  %v241_v50 = vld [vmem:[%s1107_s0] sm:$0xe] }
   0x8   :  { %v45_v23 = vor.u32 %v44_v14, %v41_v13  ;;  %795 = vmatprep.mubr.msk.bf16.mxu1 %vm108_vm0, %v728_v15  ;;  %799 = vmatprep.subr.bf16.mxu0 %v940_v16  ;;  %v55_v29 = vor.u32 %v54_v19, %v50_v18  ;;  %v72_v31 = vshll.u32 %v953_v25, 16  ;;  %v76_v32 = vshrl.u32 %v953_v25, 16  ;;  %v992_v54 = vld [vmem:[%s1107_s0 + $0x8] sm:$0x3]  ;;  %v843_v1 = vld [vmem:[%s1108_s1 + $0x20] sm:$0xff]  }
   0x9   :  { %807 = vmatprep.subr.bf16.mxu1 %v842_v17  ;;  %v65_v34 = vrot.slane %v63_v27, 4  ;;  %v82_v35 = vshll.u32 %v958_v26, 16  ;;  %v262_v36 = vrot.slane %v958_v26, 5  ;;  %v68_v38 = vrot.slane %v66_v30, 5  ;;  %v242_v4 = vld [vmem:[%s1107_s0 + $0xc] sm:$0xe] }
   0xa   :  { %v46_v33 = vrot.slane %v45_v23, 4  ;;  %v56_v37 = vrot.slane %v55_v29, 4  ;;  %v74_v39 = vrot.slane %v72_v31, 5  ;;  %v78_v40 = vrot.slane %v76_v32, 4  ;;  %v1015_v7 = vld [vmem:[%s1107_s0 + $0x14] sm:$0x3] }
   0xb   :  { %v84_v42 = vrot.slane %v82_v35, 5  ;;  %v383_v43 = vrot.slane %v72_v31, 6  ;;  %v729_v44 = vcombine.low %v27_v22, %v953_v25  ;;  %v69_v47 = vor.u32 %v68_v38, %v65_v34 }
   0xc   :  { %v51_v41 = vsel %vm962_vm5, %v46_v33, %v50_v18  ;;  %v61_v46 = vsel %vm962_vm5, %v56_v37, %v60_v20  ;;  %v79_v48 = vor.u32 %v78_v40, %v74_v39  ;;  %v734_v53 = vrot.slane %v241_v50, 9 }
   0xd   :  { %v722_v52 = vcombine.low %v51_v41, %v61_v46  ;;  %796 = vmatmul.mubr.msk.bf16.vlgmr.msra.gmra.mxu1 %vm108_vm0, %v729_v44  ;;  %v351_v55 = vshrl.u32 %v241_v50, 16  ;;  %v70_v56 = vrot.slane %v69_v47, 4  ;;  %v254_v58 = vrot.slane %v252_v51, 4 }
   0xe   :  { %v80_v57 = vrot.slane %v79_v48, 4  ;;  %808 = vmatpush3.bf16.msra.mxu1 %v842_v17  ;;  %vm348_vm8 = vsmask.f32 6416  ;;  %v253_v59 = vsel %vm975_vm6, %v734_v53, %v252_v51  ;;  %v354_v61 = vshll.u32 %v241_v50, 16 }
   0xf   :  { %787 = vmatprep.mubr.msk.bf16.mxu0 %vm108_vm0, %v722_v52  ;;  %809 = vmatprep.subr.bf16.mxu1 %v844_v49  ;;  %v353_v60 = vrot.slane %v351_v55, 5  ;;  %v361_v62 = vor.u32 %v360_v24, %v359_v21  ;;  %v75_v63 = vsel %vm962_vm5, %v70_v56, %v74_v39  ;;  %v256_v2 = vsel %vm975_vm6, %v254_v58, %v255_v12  ;;  %vm1022_vm10 = vmor %vm347_vm7, %vm348_vm8 }
  0x10   :  { %v85_v0 = vsel %vm962_vm5, %v80_v57, %v84_v42  ;;  %v365_v3 = vshrl.u32 %v992_v54, 16  ;;  %v736_v9 = vcombine.low %v253_v59, %v256_v2  ;;  %v356_v10 = vrot.slane %v354_v61, 6 }
  0x11   :  { %v723_v8 = vcombine.low %v75_v63, %v85_v0  ;;  %v363_v11 = vrot.slane %v361_v62, 4  ;;  %v368_v13 = vshll.u32 %v992_v54, 16  ;;  %v735_v12 = vrot.slane %v242_v4, 9 }
  0x12   :  { %810 = vmatpush3.bf16.msra.mxu1 %v844_v49  ;;  %v367_v6 = vrot.slane %v365_v3, 5  ;;  %v259_v14 = vrot.slane %v953_v25, 5  ;;  %v357_v17 = vor.u32 %v356_v10, %v353_v60  ;;  %v374_v18 = vshrl.u32 %v242_v4, 16 }
  0x13   :  { %788 = vmatmul.mubr.msk.bf16.vlgmr.msra.gmra.mxu0 %vm108_vm0, %v723_v8  ;;  %v377_v19 = vshll.u32 %v242_v4, 16  ;;  %v382_v20 = vrot.slane %v76_v32, 5  ;;  %v370_v21 = vrot.slane %v368_v13, 6  ;;  %v388_v24 = vshrl.u32 %v1015_v7, 16 }
  0x14   :  { %800 = vmatpush3.bf16.msra.mxu0 %v940_v16  ;;  %803 = vmatprep.mubr.msk.bf16.mxu0 %vm108_vm0, %v736_v9  ;;  %v260_v22 = vsel %vm975_vm6, %v735_v12, %v259_v14  ;;  %v261_v23 = vrot.slane %v259_v14, 4 }
  0x15   :  { %11 = vsyncpa [#allocation3], 0  ;;  %801 = vmatprep.subr.bf16.mxu0 %v843_v1  ;;  %v358_v27 = vrot.slane %v357_v17, 4  ;;  %v845_v28 = vld [vmem:[%s1108_s1 + $0x48] sm:$0xff]   ;;  %v376_v29 = vrot.slane %v374_v18, 5  ;;  %v379_v30 = vrot.slane %v377_v19, 6  ;;  %v384_v31 = vor.u32 %v383_v43, %v382_v20 }
  0x16   :  { %v477_v16 = vld [vmem:[%s1107_s0] sm:$0xc]  ;;  %v371_v32 = vor.u32 %v370_v21, %v367_v6  ;;  %v263_v33 = vsel %vm975_vm6, %v261_v23, %v262_v36  ;;  %v390_v34 = vrot.slane %v388_v24, 5  ;;  %v391_v35 = vshll.u32 %v1015_v7, 16  ;;  %v478_v41 = vld [vmem:[%s1107_s0 + $0xc] sm:$0xc] }
  0x17   :  { %v362_v37 = vsel %vm1022_vm10, %v358_v27, %v361_v62  ;;  %v737_v38 = vcombine.low %v260_v22, %v263_v33  ;;  %v380_v39 = vor.u32 %v379_v30, %v376_v29  ;;  %v386_v40 = vrot.slane %v384_v31, 4  ;;  %v846_v45 = vld [vmem:[%s1108_s1 + $0x40] sm:$0xff]   ;;  %v623_v62 = vld [vmem:[%s1111_s4 + $0x10] sm:$0xff]  ;;  %v622_v0 = vld [vmem:[%s1111_s4 + $0x8] sm:$0xff]  ;;  %s871_s26 = smov [#allocation2]  }
  0x18   :  { %802 = vmatpush3.bf16.msra.mxu0 %v843_v1  ;;  %v372_v26 = vsel %vm1022_vm10, %v363_v11, %v371_v32  ;;  %v393_v42 = vrot.slane %v391_v35, 6  ;;  %vm484_vm11 = vcmask 1045508   ;;  %v748_v36 = vrot.slane %v477_v16, 10  ;;  %v621_v1 = vld [vmem:[%s1111_s4] sm:$0xff]  ;;  %s714_s27 = sshll.u32 %s871_s26, 4  ;;  %s715_s27 = int_to_ptr.vmem [resolvable:$true] %s714_s27 }
  0x19   :  { %v742_v43 = vcombine.low %v362_v37, %v372_v26  ;;  %815 = vmatprep.subr.bf16.mxu0 %v845_v28  ;;  %v381_v44 = vrot.slane %v380_v39, 4  ;;  %vm1053_vm12 = vmor %vm483_vm9, %vm484_vm11  ;;  %v488_v47 = vrot.slane %v925_v5, 6  ;;  %v491_v48 = vrot.slane %v992_v54, 6  ;;  %v756_v30 = vld [vmem:[%s1109_s2] ss:$0 sm:$0xff]  ;;  %s847_s28 = scalar_lea.vmem %s715_s27, 32  ;;  %p852_p1 = scmp.lt.s32.totalorder %s715_s27, %s715_s27 }
  0x1a   :  { %v394_v49 = vor.u32 %v393_v42, %v390_v34  ;;  %v749_v50 = vrot.slane %v478_v41, 10  ;;  %v495_v51 = vrot.slane %v953_v25, 6  ;;  %v498_v52 = vrot.slane %v1015_v7, 6  ;;  %p848_p0 = scmp.ne.s32.totalorder %s715_s27, %s847_s28  ;;  %p853_p2 = scmp.lt.s32.totalorder %s847_s28, %s847_s28 }
  0x1b   :  { %811 = vmatprep.mubr.msk.bf16.mxu1 %vm108_vm0, %v742_v43  ;;  %804 = vmatmul.mubr.msk.bf16.vlgmr.msra.gmra.mxu0 %vm108_vm0, %v737_v38  ;;  %v385_v53 = vsel %vm1022_vm10, %v381_v44, %v384_v31  ;;  %v489_v55 = vsel %vm1053_vm12, %v748_v36, %v488_v47  ;;  %v490_v56 = vrot.slane %v488_v47, 4  ;;  %v869_v63 = vmov 0.0   ;;  %v596_v36 = vld [vmem:[%s1110_s3] sm:$0xff]  ;;  %v597_v47 = vld [vmem:[%s1110_s3 + $0x8] sm:$0xff] }
  0x1c   :  { %v395_v5 = vsel %vm1022_vm10, %v386_v40, %v394_v49  ;;  %816 = vmatpush3.bf16.msra.mxu0 %v845_v28  ;;  %v496_v25 = vsel %vm1053_vm12, %v749_v50, %v495_v51  ;;  %v497_v54 = vrot.slane %v495_v51, 4  ;;  %823 = vmatprep.subr.mxu1 %v869_v63  ;;  %vm870_vm13 = vmmov 0   ;;  %p854_p3 = por %p853_p2, %p852_p1 }
  0x1d   :  { %v743_v57 = vcombine.low %v385_v53, %v395_v5  ;;  %817 = vmatprep.subr.bf16.mxu0 %v846_v45  ;;  %v492_v58 = vsel %vm1053_vm12, %v490_v56, %v491_v48  ;;  %vm602_vm14 = vcmask 195584   ;;  %vm633_vm15 = vcmask 1041409  }
  0x1e   :  { %v750_v59 = vcombine.low %v489_v55, %v492_v58  ;;  %v499_v60 = vsel %vm1053_vm12, %v497_v54, %v498_v52  ;;  %p855_p4 = pnand %p854_p3, %p848_p0 }
  0x1f   :  { %812 = vmatmul.mubr.msk.bf16.vlgmr.msra.gmra.mxu1 %vm108_vm0, %v743_v57  ;;  %v751_v61 = vcombine.low %v496_v25, %v499_v60 }
  0x20   :  { %818 = vmatpush3.bf16.msra.mxu0 %v846_v45  ;;  %819 = vmatprep.mubr.msk.bf16.mxu0 %vm108_vm0, %v750_v59 }
  0x21   :  { %829 = vmatprep.mubr.msk.f32.mxu1 %vm870_vm13, %v869_v63  ;;  %824 = vmatpush3.msra.mxu1 %v623_v62 }
  0x22   :  { %825 = vmatprep.subr.mxu1 %v869_v63 }
  0x23   :  { %820 = vmatmul.mubr.msk.bf16.vlgmr.msra.gmra.mxu0 %vm108_vm0, %v751_v61  ;;  %826 = vmatpush3.msra.mxu1 %v622_v0 }
  0x24   :  { %827 = vmatprep.subr.mxu1 %v869_v63 }
  0x25   :  { %828 = vmatpush3.msra.mxu1 %v621_v1 }
  0xcd   :  { %v797_v2 = vpop.f32.mrf.mxu1 }
  0xcf   :  { %v226_v4 = vpop.f32.mrf.mxu1 }
  0xd1   :  { %v798_v9 = vpop.f32.mrf.mxu1 }
  0xd3   :  { %v789_v3 = vpop.f32.mrf.mxu0  ;;  %v229_v11 = vpop.f32.mrf.mxu1 }
  0xd4   :  { %v235_v13 = vadd.f32 %v797_v2, %v789_v3 }
  0xd5   :  { %v149_v7 = vpop.f32.mrf.mxu0 }
  0xd6   :  { %v227_v14 = vadd.f32 %v226_v4, %v149_v7 }
  0xd7   :  { %v790_v8 = vpop.f32.mrf.mxu0 }
  0xd8   :  { %v238_v19 = vadd.f32 %v798_v9, %v790_v8 }
  0xd9   :  { %v152_v10 = vpop.f32.mrf.mxu0 }
  0xda   :  { %v230_v23 = vadd.f32 %v229_v11, %v152_v10  ;;  %v757_v10 = vld [vmem:[%s1112_s5] ss:$0 sm:$0xff] }
  0xdb   :  { %v805_v6 = vpop.f32.mrf.mxu0 }
  0xdc   :  { %v343_v15 = vadd.f32 %v805_v6, %v235_v13 }
  0xdd   :  { %v326_v12 = vpop.f32.mrf.mxu0 }
  0xde   :  { %v341_v20 = vadd.f32 %v326_v12, %v227_v14 }
  0xdf   :  { %v813_v17 = vpop.f32.mrf.mxu1  ;;  %v806_v18 = vpop.f32.mrf.mxu0 }
  0xe0   :  { %v475_v24 = vadd.f32 %v813_v17, %v343_v15  ;;  %v344_v27 = vadd.f32 %v806_v18, %v238_v19 }
  0xe1   :  { %v458_v21 = vpop.f32.mrf.mxu1  ;;  %v329_v22 = vpop.f32.mrf.mxu0 }
  0xe2   :  { %v473_v31 = vadd.f32 %v458_v21, %v341_v20  ;;  %v342_v16 = vadd.f32 %v329_v22, %v230_v23 }
  0xe3   :  { %v814_v28 = vpop.f32.mrf.mxu1  ;;  %v821_v29 = vpop.f32.mrf.mxu0 }
  0xe4   :  { %v579_v32 = vadd.f32 %v821_v29, %v475_v24  ;;  %v476_v34 = vadd.f32 %v814_v28, %v344_v27 }
  0xe5   :  { %v562_v33 = vpop.f32.mrf.mxu0  ;;  %v461_v38 = vpop.f32.mrf.mxu1 }
  0xe6   :  { %v590_v35 = vadd.f32 %v756_v30, %v579_v32  ;;  %v577_v37 = vadd.f32 %v562_v33, %v473_v31  ;;  %v474_v40 = vadd.f32 %v461_v38, %v342_v16 }
  0xe7   :  { %v822_v39 = vpop.f32.mrf.mxu0 }
  0xe8   :  { %v594_v41 = vmax.f32 %v590_v35, 0.0  ;;  %v588_v26 = vadd.f32 %v756_v30, %v577_v37  ;;  %v580_v42 = vadd.f32 %v822_v39, %v476_v34 }
  0xe9   :  { %v565_v43 = vpop.f32.mrf.mxu0 }
  0xea   :  { %v592_v44 = vmax.f32 %v588_v26, 0.0  ;;  %v591_v45 = vadd.f32 %v756_v30, %v580_v42  ;;  %v578_v46 = vadd.f32 %v565_v43, %v474_v40  ;;  %v600_v48 = vmul.f32 %v596_v36, %v594_v41 }
  0xec   :  { %v595_v49 = vmax.f32 %v591_v45, 0.0  ;;  %v589_v50 = vadd.f32 %v756_v30, %v578_v46  ;;  %v598_v51 = vmul.f32 %v596_v36, %v592_v44  ;;  %v612_v56 = vsel %vm602_vm14, %v600_v48, -inf }
  0xee   :  { %v601_v52 = vmul.f32 %v597_v47, %v595_v49  ;;  %v593_v53 = vmax.f32 %v589_v50, 0.0  ;;  %v603_v54 = vsel %vm602_vm14, %v598_v51, -inf }
  0xf0   :  { %v599_v55 = vmul.f32 %v597_v47, %v593_v53  ;;  %v613_v5 = vsel %vm602_vm14, %v601_v52, -inf }
  0xf1   :  { %v614_v25 = vmax.f32 %v612_v56, %v613_v5 }
  0xf2   :  { %v604_v57 = vsel %vm602_vm14, %v599_v55, -inf }
  0xf3   :  { %v605_v58 = vmax.f32 %v603_v54, %v604_v57  ;;  %v615_v59 = vrot.slane %v614_v25, 4 }
  0xf5   :  { %v606_v60 = vrot.slane %v605_v58, 4  ;;  %v616_v61 = vmax.f32 %v614_v25, %v615_v59 }
  0xf7   :  { %v607_v62 = vmax.f32 %v605_v58, %v606_v60  ;;  %v617_v63 = vrot.slane %v616_v61, 2 }
  0xf9   :  { %v608_v0 = vrot.slane %v607_v62, 2  ;;  %v618_v1 = vmax.f32 %v616_v61, %v617_v63 }
  0xfb   :  { %v609_v2 = vmax.f32 %v607_v62, %v608_v0  ;;  %v619_v3 = vrot.slane %v618_v1, 1 }
  0xfd   :  { %v610_v4 = vrot.slane %v609_v2, 1  ;;  %v620_v8 = vmax.f32 %v618_v1, %v619_v3 }
  0xff   :  { %v611_v7 = vmax.f32 %v609_v2, %v610_v4 }
 0x101   :  { %v634_v9 = vsel %vm633_vm15, %v620_v8, %v611_v7 }
 0x102   :  { %830 = vmatmul.mubr.msk.f32.vlgmr.msra.gmra.mxu1 %vm602_vm14, %v634_v9 }
 0x1c2   :  { %v703_v11 = vpop.f32.mrf.mxu1 }
 0x1c3   :  { %v704_v6 = vadd.f32 %v757_v10, %v703_v11 }
 0x1c4   :  { %v831_v13 = vpop.f32.mrf.mxu1 }
 0x1c5   :  { %707 = vst [vmem:[#allocation2] sm:$0x3] %v704_v6 }
 0x1c6   :  { %858 = shalt.err (!%p855_p4)
}
 0x1c7   :  { %717 = dma.vmem_to_hbm [thread:$0]  %s715_s27, 32, %s1113_s6, [#allocation3]  }
 0x1c8   :  { %867 = dma.done.wait [#allocation3], 32  }
 0x1c9   :  { %868 = vsyncadd [#allocation3], 4294967264 }
 0x1ca   :  { %721 = vsyncpa [#allocation3], 1 }

</bundles_post_ra>
